<compile_context>
chip_gen: v6e
topology: v6e:2x2x1
jax: 0.10.0
libtpu: 0.0.40
codegen_flags: <defaults>
</compile_context>

<pallas_src>
import math

import jax
import jax.numpy as jnp
from jax.experimental import pallas as pl
from jax.experimental.pallas import tpu as pltpu

# ---- small, module-consistent shapes (original: C=1024, H,W=50,80) ----------
C = 64                        # feature_map_channel
H, W = 8, 16                  # feature map spatial size (HW == 128 lanes)
HW = H * W
A = 15                        # 5 sizes * 3 aspect ratios
F = 16                        # sublane-aligned field height (A anchors + 1 pad row)
HEAD_M = 128                  # head rows: [scores|dx|dy|dw|dh] * 16 + 48 pad
STRIDE = 16
IMG_H, IMG_W = H * STRIDE, W * STRIDE          # image shape used for clamping
SCALE_CLAMP = math.log(1000.0 / 16.0)          # standard detectron2 delta clamp


# ----------------------------- Pallas kernel ---------------------------------
def rpn_fused_kernel(xcol_ref, wc_ref, bc_ref, wh_ref, bh_ref, anc_ref, out_ref):
    # 3x3 conv: one (C, 9C) @ (9C, HW) matmul; channels on sublanes, HW on lanes.
    x = jnp.dot(wc_ref[...], xcol_ref[...], preferred_element_type=jnp.float32)
    x = jnp.maximum(x + bc_ref[...], 0.0)               # per-channel bias + ReLU

    # Both 1x1 heads (with anchor w/h folded into the weights/biases) as one
    # (128, C) @ (C, HW) matmul; output rows are 16-row sublane-aligned fields.
    head = jnp.dot(wh_ref[...], x, preferred_element_type=jnp.float32) + bh_ref[...]

    # Box decode: every slice below is a sublane-aligned 16-row group (free
    # vreg selection), the adds/mins are plain aligned elementwise VPU work,
    # exp goes to the EUP.
    pcx = head[1 * F:2 * F, :] + anc_ref[0 * F:1 * F, :]          # dx*aw + acx
    pcy = head[2 * F:3 * F, :] + anc_ref[1 * F:2 * F, :]          # dy*ah + acy
    pw = jnp.exp(jnp.minimum(head[3 * F:4 * F, :], anc_ref[2 * F:3 * F, :]))
    ph = jnp.exp(jnp.minimum(head[4 * F:5 * F, :], anc_ref[3 * F:4 * F, :]))
    x1 = jnp.clip(pcx - 0.5 * pw, 0.0, float(IMG_W))
    y1 = jnp.clip(pcy - 0.5 * ph, 0.0, float(IMG_H))
    x2 = jnp.clip(pcx + 0.5 * pw, 0.0, float(IMG_W))
    y2 = jnp.clip(pcy + 0.5 * ph, 0.0, float(IMG_H))

    # Lane-dense (128, 128) output written as unmasked 128-wide stores to
    # disjoint, sublane-aligned 16-row groups (no lane-axis concatenation).
    out_ref[0 * F:1 * F, :] = head[0 * F:1 * F, :]      # objectness scores
    out_ref[1 * F:2 * F, :] = x1
    out_ref[2 * F:3 * F, :] = y1
    out_ref[3 * F:4 * F, :] = x2
    out_ref[4 * F:5 * F, :] = y2
    out_ref[5 * F:, :] = head[5 * F:, :]                # already zero (padded rows)


def _vmem():
    return pl.BlockSpec(memory_space=pltpu.MemorySpace.VMEM)


def rpn_fused(xcol, wc, bc, wh, bh, anc):
    # Gridless single invocation: the whole problem (<1 MiB live) fits VMEM on
    # every generation (including v7x's 64 MiB).
    # TODO(synk): at the original scale (C=1024, 50x80) this must become a
    # (M, K)-tiled grid: K (=9C) innermost and "arbitrary" with an f32 VMEM
    # accumulator (pl.when init/finalize), the M axis "parallel" so v7x's two
    # TensorCores split the spatial rows, K tiles ~1024-1536 on v5e/v6e but
    # halved on v7x (64 MiB VMEM), weights streamed via a k-indexed BlockSpec,
    # and vmem_limit_bytes raised explicitly.
    return pl.pallas_call(
        rpn_fused_kernel,
        out_shape=jax.ShapeDtypeStruct((HEAD_M, HW), jnp.float32),
        in_specs=[_vmem()] * 6,
        out_specs=_vmem(),
    )(xcol, wc, bc, wh, bh, anc)


# ------------------------------ glue (plain JAX) ------------------------------
def anchor_dims():
    sizes = jnp.array([16.0, 32.0, 48.0, 64.0, 96.0], jnp.float32)
    ratios = jnp.array([0.5, 1.0, 2.0], jnp.float32)
    ws = (sizes[:, None] / jnp.sqrt(ratios)[None, :]).reshape(-1)   # (15,)
    hs = (sizes[:, None] * jnp.sqrt(ratios)[None, :]).reshape(-1)
    return ws, hs


def make_anchors():
    ws, hs = anchor_dims()
    base = jnp.stack([-ws / 2, -hs / 2, ws / 2, hs / 2], axis=-1)   # (15, 4)
    shift_x = (jnp.arange(W, dtype=jnp.float32) + 0.5) * STRIDE
    shift_y = (jnp.arange(H, dtype=jnp.float32) + 0.5) * STRIDE
    sy, sx = jnp.meshgrid(shift_y, shift_x, indexing="ij")
    shifts = jnp.stack([sx, sy, sx, sy], axis=-1).reshape(HW, 1, 4)
    return (shifts + base[None]).reshape(HW * A, 4)                 # (N, 4)


def pack_anchor_constants():
    """Anchor constants as 4 sublane-aligned 16-row fields over HW lanes.

    rows  0:16  anchor center x (per spatial position; same for all anchors)
    rows 16:32  anchor center y
    rows 32:48  SCALE_CLAMP + log(anchor width)  (per anchor; same for all HW)
    rows 48:64  SCALE_CLAMP + log(anchor height)
    """
    aw, ah = anchor_dims()
    shift_x = (jnp.arange(W, dtype=jnp.float32) + 0.5) * STRIDE
    shift_y = (jnp.arange(H, dtype=jnp.float32) + 0.5) * STRIDE
    acx = jnp.broadcast_to(shift_x[None, :], (H, W)).reshape(1, HW)
    acy = jnp.broadcast_to(shift_y[:, None], (H, W)).reshape(1, HW)
    clamp_w = jnp.pad(SCALE_CLAMP + jnp.log(aw), (0, F - A))
    clamp_h = jnp.pad(SCALE_CLAMP + jnp.log(ah), (0, F - A))
    return jnp.concatenate([
        jnp.broadcast_to(acx, (F, HW)),
        jnp.broadcast_to(acy, (F, HW)),
        jnp.broadcast_to(clamp_w[:, None], (F, HW)),
        jnp.broadcast_to(clamp_h[:, None], (F, HW)),
    ], axis=0).astype(jnp.float32)                                   # (64, HW)


def pack_params(w_conv, b_conv, w_scores, b_scores, w_deltas, b_deltas):
    """Pack PyTorch-layout weights into the fused-kernel layout (done once).

    Anchor widths/heights are folded into the head weights/biases (dx*aw,
    dy*ah, dw+log(aw), dh+log(ah)); combined with the per-row clamp constants
    from pack_anchor_constants this is equivalent to the detectron2 decode.
    """
    aw, ah = anchor_dims()
    # conv: HWIO (3,3,Cin,Cout) -> (Cout, 9*Cin); columns blocked (ky,kx)-major,
    # input-channel-minor to match the im2col slab built by _make_xcol.
    wc = jnp.transpose(w_conv, (3, 0, 1, 2)).reshape(C, 9 * C).astype(jnp.float32)
    bc = b_conv.reshape(C, 1).astype(jnp.float32)

    wd = w_deltas.reshape(C, A, 4)                       # columns are a*4 + coord
    bd = b_deltas.reshape(A, 4)
    w_fields = [w_scores,
                wd[:, :, 0] * aw[None, :], wd[:, :, 1] * ah[None, :],
                wd[:, :, 2], wd[:, :, 3]]
    b_fields = [b_scores,
                bd[:, 0] * aw, bd[:, 1] * ah,
                bd[:, 2] + jnp.log(aw), bd[:, 3] + jnp.log(ah)]
    pad_w = lambda m: jnp.pad(m, ((0, 0), (0, F - A)))
    pad_b = lambda v: jnp.pad(v, (0, F - A))
    wh = jnp.concatenate([pad_w(m) for m in w_fields]
                         + [jnp.zeros((C, HEAD_M - 5 * F), jnp.float32)],
                         axis=1).T.astype(jnp.float32)               # (128, C)
    bh = jnp.concatenate([pad_b(v) for v in b_fields]
                         + [jnp.zeros((HEAD_M - 5 * F,), jnp.float32)]
                         ).reshape(HEAD_M, 1).astype(jnp.float32)    # (128, 1)
    return {"wc": wc, "bc": bc, "wh": wh, "bh": bh}


def _make_xcol(feature_map_nchw):
    """NCHW -> channel-major im2col slab (9C, HW); no NCHW->NHWC transpose."""
    x = feature_map_nchw[0]                                          # (C, H, W)
    xp = jnp.pad(x, ((0, 0), (1, 1), (1, 1)))                        # (C, H+2, W+2)
    taps = [xp[:, ky:ky + H, kx:kx + W] for ky in range(3) for kx in range(3)]
    return jnp.concatenate(taps, axis=0).reshape(9 * C, HW).astype(jnp.float32)


def tiny_rpn_forward(feature_map_nchw, packed, anc):
    # TODO(synk): with multiple images / FPN levels, stack them along the lane
    # (HW) axis and make a single pallas_call to amortize launch overhead.
    xcol = _make_xcol(feature_map_nchw)
    out = rpn_fused(xcol, packed["wc"], packed["bc"], packed["wh"],
                    packed["bh"], anc)                                # (128, HW)

    # scores ordering == permute(0,2,3,1).reshape(-1) == (H, W, A) flatten.
    scores = out[0:A, :].T.reshape(-1)                                # (HW*A,)
    # proposals: rows = hw*A + a, cols = [x1, y1, x2, y2].
    coords = out[F:5 * F, :].reshape(4, F, HW)[:, :A, :]              # (4, A, HW)
    proposals = jnp.transpose(coords, (2, 1, 0)).reshape(HW * A, 4)

    # find_top_rpn_proposals (fixed-shape variant).
    pre_nms_topk = min(1000, scores.shape[0])
    top_scores, idx = jax.lax.top_k(scores, pre_nms_topk)
    top_props = proposals[idx]
    bw = top_props[:, 2] - top_props[:, 0]
    bh = top_props[:, 3] - top_props[:, 1]
    keep = (jnp.all(jnp.isfinite(top_props), axis=1) & jnp.isfinite(top_scores)
            & (bw > 0) & (bh > 0))
    top_scores = jnp.where(keep, top_scores, -jnp.inf)
    # TODO(synk): torchvision NMS + shape-changing boolean filtering have no
    # clean fixed-shape Pallas equivalent; invalid boxes are masked with -inf
    # scores instead of being removed, and NMS is skipped.
    return top_props, top_scores


def reference_forward(feature_map_nchw, w_conv, b_conv, w_scores, b_scores,
                      w_deltas, b_deltas, anchors):
    """Pure-JAX f32 (HIGHEST precision) reference of the conv/heads/decode path."""
    dn = ("NCHW", "HWIO", "NCHW")
    prec = jax.lax.Precision.HIGHEST
    x = jax.lax.conv_general_dilated(feature_map_nchw, w_conv, (1, 1), "SAME",
                                     dimension_numbers=dn, precision=prec)
    x = jax.nn.relu(x + b_conv.reshape(1, C, 1, 1))
    s = jax.lax.conv_general_dilated(x, w_scores.reshape(1, 1, C, A), (1, 1),
                                     "VALID", dimension_numbers=dn, precision=prec)
    s = s + b_scores.reshape(1, A, 1, 1)
    d = jax.lax.conv_general_dilated(x, w_deltas.reshape(1, 1, C, 4 * A), (1, 1),
                                     "VALID", dimension_numbers=dn, precision=prec)
    d = d + b_deltas.reshape(1, 4 * A, 1, 1)
    scores = jnp.transpose(s, (0, 2, 3, 1)).reshape(-1)
    deltas = jnp.transpose(d.reshape(1, A, 4, H, W), (0, 3, 4, 1, 2)).reshape(-1, 4)
    aw = anchors[:, 2] - anchors[:, 0]
    ah = anchors[:, 3] - anchors[:, 1]
    acx = anchors[:, 0] + 0.5 * aw
    acy = anchors[:, 1] + 0.5 * ah
    dw = jnp.minimum(deltas[:, 2], SCALE_CLAMP)
    dh = jnp.minimum(deltas[:, 3], SCALE_CLAMP)
    pcx = deltas[:, 0] * aw + acx
    pcy = deltas[:, 1] * ah + acy
    pw = jnp.exp(dw) * aw
    ph = jnp.exp(dh) * ah
    x1 = jnp.clip(pcx - 0.5 * pw, 0.0, float(IMG_W))
    y1 = jnp.clip(pcy - 0.5 * ph, 0.0, float(IMG_H))
    x2 = jnp.clip(pcx + 0.5 * pw, 0.0, float(IMG_W))
    y2 = jnp.clip(pcy + 0.5 * ph, 0.0, float(IMG_H))
    return scores, jnp.stack([x1, y1, x2, y2], axis=1)


if __name__ == "__main__":
    key = jax.random.PRNGKey(0)
    k1, k2, k3, k4 = jax.random.split(key, 4)
    w_conv = 0.05 * jax.random.normal(k1, (3, 3, C, C), jnp.float32)   # HWIO
    b_conv = jnp.full((C,), 0.01, jnp.float32)
    w_scores = 0.05 * jax.random.normal(k2, (C, A), jnp.float32)
    b_scores = jnp.zeros((A,), jnp.float32)
    w_deltas = 0.02 * jax.random.normal(k3, (C, 4 * A), jnp.float32)
    b_deltas = jnp.zeros((4 * A,), jnp.float32)
    feature_map = jax.random.normal(k4, (1, C, H, W), jnp.float32)

    anchors = make_anchors()
    # Loop-invariant packing: done once, outside the kernel / forward pass.
    anc = pack_anchor_constants()
    packed = pack_params(w_conv, b_conv, w_scores, b_scores, w_deltas, b_deltas)

    fwd = jax.jit(tiny_rpn_forward)
    proposals, scores = fwd(feature_map, packed, anc)
    jax.block_until_ready((proposals, scores))

    # --- sanity-check the fused Pallas kernel against the pure-JAX reference ---
    ref_scores, ref_props = reference_forward(feature_map, w_conv, b_conv,
                                              w_scores, b_scores, w_deltas,
                                              b_deltas, anchors)
    out = rpn_fused(_make_xcol(feature_map), packed["wc"], packed["bc"],
                    packed["wh"], packed["bh"], anc)
    k_scores = out[0:A, :].T.reshape(-1)
    k_coords = out[F:5 * F, :].reshape(4, F, HW)[:, :A, :]
    k_props = jnp.transpose(k_coords, (2, 1, 0)).reshape(HW * A, 4)
    # f32 operands end-to-end -> observed error is tiny; tolerances leave
    # headroom for a lower-precision MXU pass on the f32 dots.
    assert jnp.allclose(k_scores, ref_scores, atol=2e-2, rtol=1e-3), \
        float(jnp.max(jnp.abs(k_scores - ref_scores)))
    assert jnp.allclose(k_props, ref_props, atol=1.0, rtol=1e-3), \
        float(jnp.max(jnp.abs(k_props - ref_props)))
    assert proposals.shape == (min(1000, HW * A), 4)
    assert scores.shape == (min(1000, HW * A),)
    assert bool(jnp.all(jnp.isfinite(proposals)))

    print("KERNEL_OK")
</pallas_src>

<mosaic_0001>
module attributes {stable_mosaic.version = 11 : i64} {
  func.func @rpn_fused_kernel(%arg0: memref<576x128xf32, #tpu.memory_space<vmem>>, %arg1: memref<64x576xf32, #tpu.memory_space<vmem>>, %arg2: memref<64x1xf32, #tpu.memory_space<vmem>>, %arg3: memref<128x64xf32, #tpu.memory_space<vmem>>, %arg4: memref<128x1xf32, #tpu.memory_space<vmem>>, %arg5: memref<64x128xf32, #tpu.memory_space<vmem>>, %arg6: memref<128x128xf32, #tpu.memory_space<vmem>>) attributes {dimension_semantics = [], scalar_prefetch = 0 : i64, scratch_operands = 0 : i64, tpu.core_type = #tpu.core_type<tc>} {
    %c0 = arith.constant 0 : index
    %c0_0 = arith.constant 0 : index
    %0 = vector.load %arg1[%c0, %c0_0] : memref<64x576xf32, #tpu.memory_space<vmem>>, vector<64x576xf32>
    %c0_1 = arith.constant 0 : index
    %c0_2 = arith.constant 0 : index
    %1 = vector.load %arg0[%c0_1, %c0_2] : memref<576x128xf32, #tpu.memory_space<vmem>>, vector<576x128xf32>
    %cst = arith.constant dense<0.000000e+00> : vector<64x128xf32>
    %2 = tpu.matmul %0, %1, %cst {dimension_numbers = #tpu.dot_dimension_numbers<[1], [0], [0], [1], [0, 0, 1, 1], [], []>} : vector<64x576xf32>, vector<576x128xf32>, vector<64x128xf32> -> vector<64x128xf32>
    %c0_3 = arith.constant 0 : index
    %c0_4 = arith.constant 0 : index
    %3 = vector.load %arg2[%c0_3, %c0_4] : memref<64x1xf32, #tpu.memory_space<vmem>>, vector<64x1xf32>
    %4 = vector.broadcast %3 : vector<64x1xf32> to vector<64x128xf32>
    %5 = arith.addf %2, %4 : vector<64x128xf32>
    %cst_5 = arith.constant 0.000000e+00 : f32
    %6 = vector.broadcast %cst_5 : f32 to vector<64x128xf32>
    %7 = arith.maximumf %5, %6 : vector<64x128xf32>
    %c0_6 = arith.constant 0 : index
    %c0_7 = arith.constant 0 : index
    %8 = vector.load %arg3[%c0_6, %c0_7] : memref<128x64xf32, #tpu.memory_space<vmem>>, vector<128x64xf32>
    %cst_8 = arith.constant dense<0.000000e+00> : vector<128x128xf32>
    %9 = tpu.matmul %8, %7, %cst_8 {dimension_numbers = #tpu.dot_dimension_numbers<[1], [0], [0], [1], [0, 0, 1, 1], [], []>} : vector<128x64xf32>, vector<64x128xf32>, vector<128x128xf32> -> vector<128x128xf32>
    %c0_9 = arith.constant 0 : index
    %c0_10 = arith.constant 0 : index
    %10 = vector.load %arg4[%c0_9, %c0_10] : memref<128x1xf32, #tpu.memory_space<vmem>>, vector<128x1xf32>
    %11 = vector.broadcast %10 : vector<128x1xf32> to vector<128x128xf32>
    %12 = arith.addf %9, %11 : vector<128x128xf32>
    %13 = vector.extract_strided_slice %12 {offsets = [16, 0], sizes = [16, 128], strides = [1, 1]} : vector<128x128xf32> to vector<16x128xf32>
    %c0_11 = arith.constant 0 : index
    %c0_12 = arith.constant 0 : index
    %14 = vector.load %arg5[%c0_11, %c0_12] : memref<64x128xf32, #tpu.memory_space<vmem>>, vector<16x128xf32>
    %15 = arith.addf %13, %14 : vector<16x128xf32>
    %16 = vector.extract_strided_slice %12 {offsets = [32, 0], sizes = [16, 128], strides = [1, 1]} : vector<128x128xf32> to vector<16x128xf32>
    %c16 = arith.constant 16 : index
    %c0_13 = arith.constant 0 : index
    %17 = vector.load %arg5[%c16, %c0_13] : memref<64x128xf32, #tpu.memory_space<vmem>>, vector<16x128xf32>
    %18 = arith.addf %16, %17 : vector<16x128xf32>
    %19 = vector.extract_strided_slice %12 {offsets = [48, 0], sizes = [16, 128], strides = [1, 1]} : vector<128x128xf32> to vector<16x128xf32>
    %c32 = arith.constant 32 : index
    %c0_14 = arith.constant 0 : index
    %20 = vector.load %arg5[%c32, %c0_14] : memref<64x128xf32, #tpu.memory_space<vmem>>, vector<16x128xf32>
    %21 = arith.minimumf %19, %20 : vector<16x128xf32>
    %22 = math.exp %21 : vector<16x128xf32>
    %23 = vector.extract_strided_slice %12 {offsets = [64, 0], sizes = [16, 128], strides = [1, 1]} : vector<128x128xf32> to vector<16x128xf32>
    %c48 = arith.constant 48 : index
    %c0_15 = arith.constant 0 : index
    %24 = vector.load %arg5[%c48, %c0_15] : memref<64x128xf32, #tpu.memory_space<vmem>>, vector<16x128xf32>
    %25 = arith.minimumf %23, %24 : vector<16x128xf32>
    %26 = math.exp %25 : vector<16x128xf32>
    %cst_16 = arith.constant 5.000000e-01 : f32
    %27 = vector.broadcast %cst_16 : f32 to vector<16x128xf32>
    %28 = arith.mulf %27, %22 : vector<16x128xf32>
    %29 = arith.subf %15, %28 : vector<16x128xf32>
    %cst_17 = arith.constant 0.000000e+00 : f32
    %cst_18 = arith.constant 2.560000e+02 : f32
    %30 = vector.broadcast %cst_17 : f32 to vector<16x128xf32>
    %31 = arith.maximumf %30, %29 : vector<16x128xf32>
    %32 = vector.broadcast %cst_18 : f32 to vector<16x128xf32>
    %33 = arith.minimumf %32, %31 : vector<16x128xf32>
    %cst_19 = arith.constant 5.000000e-01 : f32
    %34 = vector.broadcast %cst_19 : f32 to vector<16x128xf32>
    %35 = arith.mulf %34, %26 : vector<16x128xf32>
    %36 = arith.subf %18, %35 : vector<16x128xf32>
    %cst_20 = arith.constant 0.000000e+00 : f32
    %cst_21 = arith.constant 1.280000e+02 : f32
    %37 = vector.broadcast %cst_20 : f32 to vector<16x128xf32>
    %38 = arith.maximumf %37, %36 : vector<16x128xf32>
    %39 = vector.broadcast %cst_21 : f32 to vector<16x128xf32>
    %40 = arith.minimumf %39, %38 : vector<16x128xf32>
    %cst_22 = arith.constant 5.000000e-01 : f32
    %41 = vector.broadcast %cst_22 : f32 to vector<16x128xf32>
    %42 = arith.mulf %41, %22 : vector<16x128xf32>
    %43 = arith.addf %15, %42 : vector<16x128xf32>
    %cst_23 = arith.constant 0.000000e+00 : f32
    %cst_24 = arith.constant 2.560000e+02 : f32
    %44 = vector.broadcast %cst_23 : f32 to vector<16x128xf32>
    %45 = arith.maximumf %44, %43 : vector<16x128xf32>
    %46 = vector.broadcast %cst_24 : f32 to vector<16x128xf32>
    %47 = arith.minimumf %46, %45 : vector<16x128xf32>
    %cst_25 = arith.constant 5.000000e-01 : f32
    %48 = vector.broadcast %cst_25 : f32 to vector<16x128xf32>
    %49 = arith.mulf %48, %26 : vector<16x128xf32>
    %50 = arith.addf %18, %49 : vector<16x128xf32>
    %cst_26 = arith.constant 0.000000e+00 : f32
    %cst_27 = arith.constant 1.280000e+02 : f32
    %51 = vector.broadcast %cst_26 : f32 to vector<16x128xf32>
    %52 = arith.maximumf %51, %50 : vector<16x128xf32>
    %53 = vector.broadcast %cst_27 : f32 to vector<16x128xf32>
    %54 = arith.minimumf %53, %52 : vector<16x128xf32>
    %55 = vector.extract_strided_slice %12 {offsets = [0, 0], sizes = [16, 128], strides = [1, 1]} : vector<128x128xf32> to vector<16x128xf32>
    %c0_28 = arith.constant 0 : index
    %c0_29 = arith.constant 0 : index
    %56 = vector.load %arg6[%c0_28, %c0_29] : memref<128x128xf32, #tpu.memory_space<vmem>>, vector<16x128xf32>
    tpu.vector_store %arg6[%c0_28, %c0_29], %55 {strides = array<i32>} : memref<128x128xf32, #tpu.memory_space<vmem>>, vector<16x128xf32>,
    %c16_30 = arith.constant 16 : index
    %c0_31 = arith.constant 0 : index
    %57 = vector.load %arg6[%c16_30, %c0_31] : memref<128x128xf32, #tpu.memory_space<vmem>>, vector<16x128xf32>
    tpu.vector_store %arg6[%c16_30, %c0_31], %33 {strides = array<i32>} : memref<128x128xf32, #tpu.memory_space<vmem>>, vector<16x128xf32>,
    %c32_32 = arith.constant 32 : index
    %c0_33 = arith.constant 0 : index
    %58 = vector.load %arg6[%c32_32, %c0_33] : memref<128x128xf32, #tpu.memory_space<vmem>>, vector<16x128xf32>
    tpu.vector_store %arg6[%c32_32, %c0_33], %40 {strides = array<i32>} : memref<128x128xf32, #tpu.memory_space<vmem>>, vector<16x128xf32>,
    %c48_34 = arith.constant 48 : index
    %c0_35 = arith.constant 0 : index
    %59 = vector.load %arg6[%c48_34, %c0_35] : memref<128x128xf32, #tpu.memory_space<vmem>>, vector<16x128xf32>
    tpu.vector_store %arg6[%c48_34, %c0_35], %47 {strides = array<i32>} : memref<128x128xf32, #tpu.memory_space<vmem>>, vector<16x128xf32>,
    %c64 = arith.constant 64 : index
    %c0_36 = arith.constant 0 : index
    %60 = vector.load %arg6[%c64, %c0_36] : memref<128x128xf32, #tpu.memory_space<vmem>>, vector<16x128xf32>
    tpu.vector_store %arg6[%c64, %c0_36], %54 {strides = array<i32>} : memref<128x128xf32, #tpu.memory_space<vmem>>, vector<16x128xf32>,
    %61 = vector.extract_strided_slice %12 {offsets = [80, 0], sizes = [48, 128], strides = [1, 1]} : vector<128x128xf32> to vector<48x128xf32>
    %c80 = arith.constant 80 : index
    %c0_37 = arith.constant 0 : index
    %62 = vector.load %arg6[%c80, %c0_37] : memref<128x128xf32, #tpu.memory_space<vmem>>, vector<48x128xf32>
    tpu.vector_store %arg6[%c80, %c0_37], %61 {strides = array<i32>} : memref<128x128xf32, #tpu.memory_space<vmem>>, vector<48x128xf32>,
    return
  }
}

</mosaic_0001>

<bundles_post_ra>
// kernel: tiny_rpn_forward.1
= control target key start
LH: loop header
LB: loop body
LE: loop exit
PB: predicated region body
PF: predicated region fallthrough
CT: control target
= control target key end

     0   :  { %v1179_v3 = vmov 0   ;;  %vm183_vm0 = vcmask 523264   ;;  %s1806_s0 = inlined_call_operand.vmem [shape: f32[576,128], index: 0, kind: input, shape index: {}]   ;;  %s1807_s1 = inlined_call_operand.vmem [shape: f32[64,576], index: 1, kind: input, shape index: {}]   ;;  %s1808_s2 = inlined_call_operand.vmem [shape: f32[64,1], index: 2, kind: input, shape index: {}]   ;;  %s1809_s4 = inlined_call_operand.vmem [shape: f32[128,1], index: 4, kind: input, shape index: {}]   ;;  %s1810_s3 = inlined_call_operand.vmem [shape: f32[128,64], index: 3, kind: input, shape index: {}]   ;;  %s1811_s6 = inlined_call_operand.vmem [shape: f32[128,128], index: 6, kind: output, shape index: {}]   ;;  %s1812_s5 = inlined_call_operand.vmem [shape: f32[64,128], index: 5, kind: input, shape index: {}]  }
   0x1   :  { %v94_v0 = vld [vmem:[%s1806_s0 + $0xf8] sm:$0xff]  ;;  %v93_v2 = vld [vmem:[%s1806_s0 + $0xf0] sm:$0xff]  ;;  %1170 = vset.pattern.permute.xlu1 %v1179_v3  ;;  %1169 = vset.pattern.permute.xlu0 %v1179_v3  ;;  %v92_v7 = vld [vmem:[%s1806_s0 + $0xe8] sm:$0xff] }
   0x2   :  { %v78_v1 = vld [vmem:[%s1806_s0 + $0x78] sm:$0xff]  ;;  %932 = vmatprep.subr.mxu0 %v94_v0  ;;  %v77_v5 = vld [vmem:[%s1806_s0 + $0x70] sm:$0xff]  ;;  %v76_v9 = vld [vmem:[%s1806_s0 + $0x68] sm:$0xff] }
   0x3   :  { %v126_v4 = vld [vmem:[%s1806_s0 + $0x1f8] sm:$0xff]  ;;  %933 = vmatpush3.msra.mxu0 %v78_v1  ;;  %v125_v8 = vld [vmem:[%s1806_s0 + $0x1f0] sm:$0xff]  ;;  %v124_v11 = vld [vmem:[%s1806_s0 + $0x1e8] sm:$0xff] }
   0x4   :  { %v110_v6 = vld [vmem:[%s1806_s0 + $0x178] sm:$0xff]  ;;  %988 = vmatprep.subr.mxu1 %v126_v4  ;;  %934 = vmatprep.subr.mxu0 %v93_v2  ;;  %v109_v10 = vld [vmem:[%s1806_s0 + $0x170] sm:$0xff]  ;;  %v91_v12 = vld [vmem:[%s1806_s0 + $0xe0] sm:$0xff] }
   0x5   :  { %989 = vmatpush3.msra.mxu1 %v110_v6  ;;  %935 = vmatpush3.msra.mxu0 %v77_v5  ;;  %v108_v13 = vld [vmem:[%s1806_s0 + $0x168] sm:$0xff]  ;;  %v75_v14 = vld [vmem:[%s1806_s0 + $0x60] sm:$0xff]  ;;  %v90_v16 = vld [vmem:[%s1806_s0 + $0xd8] sm:$0xff] }
   0x6   :  { %990 = vmatprep.subr.mxu1 %v125_v8  ;;  %936 = vmatprep.subr.mxu0 %v92_v7  ;;  %v123_v15 = vld [vmem:[%s1806_s0 + $0x1e0] sm:$0xff]  ;;  %v74_v18 = vld [vmem:[%s1806_s0 + $0x58] sm:$0xff]  ;;  %v89_v20 = vld [vmem:[%s1806_s0 + $0xd0] sm:$0xff] }
   0x7   :  { %991 = vmatpush3.msra.mxu1 %v109_v10  ;;  %937 = vmatpush3.msra.mxu0 %v76_v9  ;;  %v107_v17 = vld [vmem:[%s1806_s0 + $0x160] sm:$0xff]  ;;  %v122_v19 = vld [vmem:[%s1806_s0 + $0x1d8] sm:$0xff]  ;;  %v73_v22 = vld [vmem:[%s1806_s0 + $0x50] sm:$0xff] }
   0x8   :  { %992 = vmatprep.subr.mxu1 %v124_v11  ;;  %938 = vmatprep.subr.mxu0 %v91_v12  ;;  %v106_v21 = vld [vmem:[%s1806_s0 + $0x158] sm:$0xff]  ;;  %v121_v23 = vld [vmem:[%s1806_s0 + $0x1d0] sm:$0xff]  ;;  %v88_v24 = vld [vmem:[%s1806_s0 + $0xc8] sm:$0xff] }
   0x9   :  { %993 = vmatpush3.msra.mxu1 %v108_v13  ;;  %939 = vmatpush3.msra.mxu0 %v75_v14  ;;  %v105_v25 = vld [vmem:[%s1806_s0 + $0x150] sm:$0xff]  ;;  %v72_v26 = vld [vmem:[%s1806_s0 + $0x48] sm:$0xff]  ;;  %v87_v28 = vld [vmem:[%s1806_s0 + $0xc0] sm:$0xff] }
   0xa   :  { %994 = vmatprep.subr.mxu1 %v123_v15  ;;  %940 = vmatprep.subr.mxu0 %v90_v16  ;;  %v120_v27 = vld [vmem:[%s1806_s0 + $0x1c8] sm:$0xff]  ;;  %v71_v30 = vld [vmem:[%s1806_s0 + $0x40] sm:$0xff]  ;;  %v86_v32 = vld [vmem:[%s1806_s0 + $0xb8] sm:$0xff] }
   0xb   :  { %995 = vmatpush3.msra.mxu1 %v107_v17  ;;  %941 = vmatpush3.msra.mxu0 %v74_v18  ;;  %v104_v29 = vld [vmem:[%s1806_s0 + $0x148] sm:$0xff]  ;;  %v119_v31 = vld [vmem:[%s1806_s0 + $0x1c0] sm:$0xff]  ;;  %v70_v34 = vld [vmem:[%s1806_s0 + $0x38] sm:$0xff] }
   0xc   :  { %996 = vmatprep.subr.mxu1 %v122_v19  ;;  %942 = vmatprep.subr.mxu0 %v89_v20  ;;  %v103_v33 = vld [vmem:[%s1806_s0 + $0x140] sm:$0xff]  ;;  %v118_v35 = vld [vmem:[%s1806_s0 + $0x1b8] sm:$0xff]  ;;  %v85_v36 = vld [vmem:[%s1806_s0 + $0xb0] sm:$0xff] }
   0xd   :  { %997 = vmatpush3.msra.mxu1 %v106_v21  ;;  %943 = vmatpush3.msra.mxu0 %v73_v22  ;;  %v102_v37 = vld [vmem:[%s1806_s0 + $0x138] sm:$0xff]  ;;  %v69_v38 = vld [vmem:[%s1806_s0 + $0x30] sm:$0xff]  ;;  %v84_v40 = vld [vmem:[%s1806_s0 + $0xa8] sm:$0xff] }
   0xe   :  { %998 = vmatprep.subr.mxu1 %v121_v23  ;;  %944 = vmatprep.subr.mxu0 %v88_v24  ;;  %v117_v39 = vld [vmem:[%s1806_s0 + $0x1b0] sm:$0xff]  ;;  %v68_v42 = vld [vmem:[%s1806_s0 + $0x28] sm:$0xff]  ;;  %v83_v44 = vld [vmem:[%s1806_s0 + $0xa0] sm:$0xff] }
   0xf   :  { %999 = vmatpush3.msra.mxu1 %v105_v25  ;;  %945 = vmatpush3.msra.mxu0 %v72_v26  ;;  %v101_v41 = vld [vmem:[%s1806_s0 + $0x130] sm:$0xff]  ;;  %v116_v43 = vld [vmem:[%s1806_s0 + $0x1a8] sm:$0xff]  ;;  %v67_v46 = vld [vmem:[%s1806_s0 + $0x20] sm:$0xff] }
  0x10   :  { %1000 = vmatprep.subr.mxu1 %v120_v27  ;;  %946 = vmatprep.subr.mxu0 %v87_v28  ;;  %v100_v45 = vld [vmem:[%s1806_s0 + $0x128] sm:$0xff]  ;;  %v115_v47 = vld [vmem:[%s1806_s0 + $0x1a0] sm:$0xff]  ;;  %v82_v48 = vld [vmem:[%s1806_s0 + $0x98] sm:$0xff] }
  0x11   :  { %1001 = vmatpush3.msra.mxu1 %v104_v29  ;;  %947 = vmatpush3.msra.mxu0 %v71_v30  ;;  %v99_v49 = vld [vmem:[%s1806_s0 + $0x120] sm:$0xff]  ;;  %v66_v50 = vld [vmem:[%s1806_s0 + $0x18] sm:$0xff]  ;;  %v81_v52 = vld [vmem:[%s1806_s0 + $0x90] sm:$0xff] }
  0x12   :  { %1002 = vmatprep.subr.mxu1 %v119_v31  ;;  %948 = vmatprep.subr.mxu0 %v86_v32  ;;  %v114_v51 = vld [vmem:[%s1806_s0 + $0x198] sm:$0xff]  ;;  %v65_v54 = vld [vmem:[%s1806_s0 + $0x10] sm:$0xff]  ;;  %v80_v56 = vld [vmem:[%s1806_s0 + $0x88] sm:$0xff] }
  0x13   :  { %1003 = vmatpush3.msra.mxu1 %v103_v33  ;;  %949 = vmatpush3.msra.mxu0 %v70_v34  ;;  %v98_v53 = vld [vmem:[%s1806_s0 + $0x118] sm:$0xff]  ;;  %v113_v55 = vld [vmem:[%s1806_s0 + $0x190] sm:$0xff]  ;;  %v64_v58 = vld [vmem:[%s1806_s0 + $0x8] sm:$0xff] }
  0x14   :  { %1004 = vmatprep.subr.mxu1 %v118_v35  ;;  %950 = vmatprep.subr.mxu0 %v85_v36  ;;  %v97_v57 = vld [vmem:[%s1806_s0 + $0x110] sm:$0xff]  ;;  %v112_v59 = vld [vmem:[%s1806_s0 + $0x188] sm:$0xff]  ;;  %v79_v60 = vld [vmem:[%s1806_s0 + $0x80] sm:$0xff] }
  0x15   :  { %1005 = vmatpush3.msra.mxu1 %v102_v37  ;;  %951 = vmatpush3.msra.mxu0 %v69_v38  ;;  %v24_v61 = vld [vmem:[%s1807_s1 + $0x8] sm:$0xff]  ;;  %v63_v62 = vld [vmem:[%s1806_s0] sm:$0xff]  ;;  %v26_v3 = vld [vmem:[%s1807_s1 + $0x18] sm:$0xff] }
  0x16   :  { %1006 = vmatprep.subr.mxu1 %v117_v39  ;;  %952 = vmatprep.subr.mxu0 %v84_v40  ;;  %v96_v63 = vld [vmem:[%s1806_s0 + $0x108] sm:$0xff]  ;;  %v23_v0 = vld [vmem:[%s1807_s1] sm:$0xff]  ;;  %v25_v4 = vld [vmem:[%s1807_s1 + $0x10] sm:$0xff] }
  0x17   :  { %1007 = vmatpush3.msra.mxu1 %v101_v41  ;;  %953 = vmatpush3.msra.mxu0 %v68_v42  ;;  %v111_v1 = vld [vmem:[%s1806_s0 + $0x180] sm:$0xff]  ;;  %v29_v5 = vld [vmem:[%s1807_s1 + $0x30] sm:$0xff]  ;;  %v134_v7 = vld [vmem:[%s1806_s0 + $0x238] sm:$0xff] }
  0x18   :  { %1008 = vmatprep.subr.mxu1 %v116_v43  ;;  %954 = vmatprep.subr.mxu0 %v83_v44  ;;  %v95_v2 = vld [vmem:[%s1806_s0 + $0x100] sm:$0xff]  ;;  %v28_v8 = vld [vmem:[%s1807_s1 + $0x28] sm:$0xff]  ;;  %v34_v9 = vld [vmem:[%s1807_s1 + $0x58] sm:$0xff] }
  0x19   :  { %1009 = vmatpush3.msra.mxu1 %v100_v45  ;;  %955 = vmatpush3.msra.mxu0 %v67_v46  ;;  %v31_v6 = vld [vmem:[%s1807_s1 + $0x40] sm:$0xff]  ;;  %v30_v10 = vld [vmem:[%s1807_s1 + $0x38] sm:$0xff]  ;;  %v133_v11 = vld [vmem:[%s1806_s0 + $0x230] sm:$0xff] }
  0x1a   :  { %1010 = vmatprep.subr.mxu1 %v115_v47  ;;  %956 = vmatprep.subr.mxu0 %v82_v48  ;;  %v36_v12 = vld [vmem:[%s1807_s1 + $0x68] sm:$0xff]  ;;  %v33_v13 = vld [vmem:[%s1807_s1 + $0x50] sm:$0xff]  ;;  %v39_v15 = vld [vmem:[%s1807_s1 + $0x80] sm:$0xff] }
  0x1b   :  { %1011 = vmatpush3.msra.mxu1 %v99_v49  ;;  %957 = vmatpush3.msra.mxu0 %v66_v50  ;;  %v132_v14 = vld [vmem:[%s1806_s0 + $0x228] sm:$0xff]  ;;  %v35_v16 = vld [vmem:[%s1807_s1 + $0x60] sm:$0xff]  ;;  %v41_v18 = vld [vmem:[%s1807_s1 + $0x90] sm:$0xff] }
  0x1c   :  { %1012 = vmatprep.subr.mxu1 %v114_v51  ;;  %958 = vmatprep.subr.mxu0 %v81_v52  ;;  %v131_v17 = vld [vmem:[%s1806_s0 + $0x220] sm:$0xff]  ;;  %v38_v19 = vld [vmem:[%s1807_s1 + $0x78] sm:$0xff]  ;;  %v44_v21 = vld [vmem:[%s1807_s1 + $0xa8] sm:$0xff] }
  0x1d   :  { %1013 = vmatpush3.msra.mxu1 %v98_v53  ;;  %959 = vmatpush3.msra.mxu0 %v65_v54  ;;  %v130_v20 = vld [vmem:[%s1806_s0 + $0x218] sm:$0xff]  ;;  %v40_v22 = vld [vmem:[%s1807_s1 + $0x88] sm:$0xff]  ;;  %v129_v23 = vld [vmem:[%s1806_s0 + $0x210] sm:$0xff] }
  0x1e   :  { %1014 = vmatprep.subr.mxu1 %v113_v55  ;;  %960 = vmatprep.subr.mxu0 %v80_v56  ;;  %v46_v24 = vld [vmem:[%s1807_s1 + $0xb8] sm:$0xff]  ;;  %v43_v25 = vld [vmem:[%s1807_s1 + $0xa0] sm:$0xff]  ;;  %v128_v26 = vld [vmem:[%s1806_s0 + $0x208] sm:$0xff] }
  0x1f   :  { %1015 = vmatpush3.msra.mxu1 %v97_v57  ;;  %961 = vmatpush3.msra.mxu0 %v64_v58  ;;  %v49_v27 = vld [vmem:[%s1807_s1 + $0xd0] sm:$0xff]  ;;  %v127_v29 = vld [vmem:[%s1806_s0 + $0x200] sm:$0xff]  ;;  %v48_v31 = vld [vmem:[%s1807_s1 + $0xc8] sm:$0xff] }
  0x20   :  { %1016 = vmatprep.subr.mxu1 %v112_v59  ;;  %962 = vmatprep.subr.mxu0 %v79_v60  ;;  %v45_v28 = vld [vmem:[%s1807_s1 + $0xb0] sm:$0xff]  ;;  %v51_v30 = vld [vmem:[%s1807_s1 + $0xe0] sm:$0xff]  ;;  %v140_v32 = vld [vmem:[%s1808_s2 + $0x28] sm:$0xff] }
  0x21   :  { %272 = vmatprep.mubr.f32.mxu0 %v24_v61  ;;  %963 = vmatpush3.msra.mxu0 %v63_v62  ;;  %v54_v33 = vld [vmem:[%s1807_s1 + $0xf8] sm:$0xff]  ;;  %v56_v36 = vld [vmem:[%s1807_s1 + $0x108] sm:$0xff]  ;;  %v53_v37 = vld [vmem:[%s1807_s1 + $0xf0] sm:$0xff] }
  0x22   :  { %1017 = vmatpush3.msra.mxu1 %v96_v63  ;;  %273 = vmatmul.mubr.f32.vlgmr.msra.gmra.mxu0 %v23_v0  ;;  %v142_v34 = vld [vmem:[%s1808_s2 + $0x38] sm:$0xff]  ;;  %v139_v38 = vld [vmem:[%s1808_s2 + $0x20] sm:$0xff]  ;;  %v141_v40 = vld [vmem:[%s1808_s2 + $0x30] sm:$0xff] }
  0x23   :  { %1018 = vmatprep.subr.mxu1 %v111_v1  ;;  %377 = vmatprep.mubr.f32.mxu1 %v26_v3  ;;  %v50_v35 = vld [vmem:[%s1807_s1 + $0xd8] sm:$0xff]  ;;  %v59_v39 = vld [vmem:[%s1807_s1 + $0x120] sm:$0xff]  ;;  %v61_v42 = vld [vmem:[%s1807_s1 + $0x130] sm:$0xff] }
  0x24   :  { %1019 = vmatpush3.msra.mxu1 %v95_v2  ;;  %277 = vmatprep.mubr.f32.mxu0 %v29_v5  ;;  %v55_v41 = vld [vmem:[%s1807_s1 + $0x100] sm:$0xff]  ;;  %v58_v43 = vld [vmem:[%s1807_s1 + $0x118] sm:$0xff]  ;;  %v137_v44 = vld [vmem:[%s1808_s2 + $0x10] sm:$0xff] }
  0x25   :  { %378 = vmatmul.mubr.f32.vlgmr.msra.gmra.mxu1 %v25_v4  ;;  %1084 = vmatprep.subr.mxu0 %v134_v7  ;;  %v27_v45 = vld [vmem:[%s1807_s1 + $0x20] sm:$0xff]  ;;  %v138_v46 = vld [vmem:[%s1808_s2 + $0x18] sm:$0xff]  ;;  %v60_v47 = vld [vmem:[%s1807_s1 + $0x128] sm:$0xff] }
  0x26   :  { %382 = vmatprep.mubr.f32.mxu1 %v31_v6  ;;  %278 = vmatmul.mubr.f32.gmra.mxu0 %v28_v8  ;;  %v32_v48 = vld [vmem:[%s1807_s1 + $0x48] sm:$0xff]  ;;  %v135_v49 = vld [vmem:[%s1808_s2] sm:$0xff]  ;;  %v37_v50 = vld [vmem:[%s1807_s1 + $0x70] sm:$0xff] }
  0x27   :  { %282 = vmatprep.mubr.f32.mxu0 %v34_v9  ;;  %1085 = vmatpush3.msra.mxu0 %v134_v7  ;;  %v136_v51 = vld [vmem:[%s1808_s2 + $0x8] sm:$0xff]  ;;  %v42_v52 = vld [vmem:[%s1807_s1 + $0x98] sm:$0xff]  ;;  %v47_v54 = vld [vmem:[%s1807_s1 + $0xc0] sm:$0xff] }
  0x28   :  { %1086 = vmatprep.subr.mxu0 %v133_v11  ;;  %170 = vperm.xlu1 %1170, %v140_v32   ;;  %v554_v53 = vld [vmem:[%s1809_s4 + $0x38] sm:$0xff]  ;;  %v553_v55 = vld [vmem:[%s1809_s4 + $0x30] sm:$0xff]  ;;  %v52_v56 = vld [vmem:[%s1807_s1 + $0xe8] sm:$0xff] }
  0x29   :  { %383 = vmatmul.mubr.f32.gmra.mxu1 %v30_v10  ;;  %1087 = vmatpush3.msra.mxu0 %v133_v11  ;;  %v556_v57 = vld [vmem:[%s1809_s4 + $0x48] sm:$0xff]  ;;  %v57_v58 = vld [vmem:[%s1807_s1 + $0x110] sm:$0xff]  ;;  %v555_v59 = vld [vmem:[%s1809_s4 + $0x40] sm:$0xff] }
  0x2a   :  { %387 = vmatprep.mubr.f32.mxu1 %v36_v12  ;;  %283 = vmatmul.mubr.f32.gmra.mxu0 %v33_v13  ;;  %v62_v60 = vld [vmem:[%s1807_s1 + $0x138] sm:$0xff]  ;;  %v549_v62 = vld [vmem:[%s1809_s4 + $0x10] sm:$0xff]  ;;  %v552_v63 = vld [vmem:[%s1809_s4 + $0x28] sm:$0xff] }
  0x2b   :  { %1088 = vmatprep.subr.mxu0 %v132_v14  ;;  %287 = vmatprep.mubr.f32.mxu0 %v39_v15  ;;  %v550_v61 = vld [vmem:[%s1809_s4 + $0x18] sm:$0xff]  ;;  %v551_v0 = vld [vmem:[%s1809_s4 + $0x20] sm:$0xff]  ;;  %v548_v1 = vld [vmem:[%s1809_s4 + $0x8] sm:$0xff] }
  0x2c   :  { %1089 = vmatpush3.msra.mxu0 %v132_v14  ;;  %180 = vperm.xlu0 %1169, %v142_v34   ;;  %v547_v2 = vld [vmem:[%s1809_s4] sm:$0xff]  ;;  %v558_v3 = vld [vmem:[%s1809_s4 + $0x58] sm:$0xff]  ;;  %v557_v4 = vld [vmem:[%s1809_s4 + $0x50] sm:$0xff] }
  0x2d   :  { %388 = vmatmul.mubr.f32.gmra.mxu1 %v35_v16  ;;  %1090 = vmatprep.subr.mxu0 %v131_v17  ;;  %v560_v5 = vld [vmem:[%s1809_s4 + $0x68] sm:$0xff]  ;;  %v559_v6 = vld [vmem:[%s1809_s4 + $0x60] sm:$0xff]  ;;  %v562_v7 = vld [vmem:[%s1809_s4 + $0x78] sm:$0xff] }
  0x2e   :  { %392 = vmatprep.mubr.f32.mxu1 %v41_v18  ;;  %1091 = vmatpush3.msra.mxu0 %v131_v17  ;;  %v561_v8 = vld [vmem:[%s1809_s4 + $0x70] sm:$0xff]  ;;  %v531_v9 = vld [vmem:[%s1810_s3] sm:$0xff] }
  0x2f   :  { %288 = vmatmul.mubr.f32.gmra.mxu0 %v38_v19  ;;  %1092 = vmatprep.subr.mxu0 %v130_v20  ;;  %v535_v10 = vld [vmem:[%s1810_s3 + $0x20] sm:$0xff] }
  0x30   :  { %292 = vmatprep.mubr.f32.mxu0 %v44_v21  ;;  %1093 = vmatpush3.msra.mxu0 %v130_v20 }
  0x31   :  { %393 = vmatmul.mubr.f32.gmra.mxu1 %v40_v22  ;;  %1094 = vmatprep.subr.mxu0 %v129_v23 }
  0x32   :  { %397 = vmatprep.mubr.f32.mxu1 %v46_v24  ;;  %1095 = vmatpush3.msra.mxu0 %v129_v23 }
  0x33   :  { %293 = vmatmul.mubr.f32.gmra.mxu0 %v43_v25  ;;  %1096 = vmatprep.subr.mxu0 %v128_v26 }
  0x34   :  { %297 = vmatprep.mubr.f32.mxu0 %v49_v27  ;;  %1097 = vmatpush3.msra.mxu0 %v128_v26 }
  0x35   :  { %398 = vmatmul.mubr.f32.gmra.mxu1 %v45_v28  ;;  %1098 = vmatprep.subr.mxu0 %v127_v29 }
  0x36   :  { %402 = vmatprep.mubr.f32.mxu1 %v51_v30  ;;  %1099 = vmatpush3.msra.mxu0 %v127_v29 }
  0x37   :  { %298 = vmatmul.mubr.f32.gmra.mxu0 %v48_v31  ;;  %165 = vperm.xlu1 %1170, %v139_v38  }
  0x38   :  { %302 = vmatprep.mubr.f32.mxu0 %v54_v33  ;;  %175 = vperm.xlu0 %1169, %v141_v40  }
  0x39   :  { %403 = vmatmul.mubr.f32.gmra.mxu1 %v50_v35 }
  0x3a   :  { %407 = vmatprep.mubr.f32.mxu1 %v56_v36 }
  0x3b   :  { %303 = vmatmul.mubr.f32.gmra.mxu0 %v53_v37  ;;  %155 = vperm.xlu1 %1170, %v137_v44  }
  0x3c   :  { %307 = vmatprep.mubr.f32.mxu0 %v59_v39  ;;  %160 = vperm.xlu0 %1169, %v138_v46  }
  0x3d   :  { %408 = vmatmul.mubr.f32.gmra.mxu1 %v55_v41 }
  0x3e   :  { %412 = vmatprep.mubr.f32.mxu1 %v61_v42 }
  0x3f   :  { %308 = vmatmul.mubr.f32.gmra.mxu0 %v58_v43  ;;  %145 = vperm.xlu1 %1170, %v135_v49  }
  0x40   :  { %1100 = vmatprep.mubr.msk.f32.mxu0 %vm183_vm0, %v27_v45  ;;  %150 = vperm.xlu0 %1169, %v136_v51  }
  0x41   :  { %413 = vmatmul.mubr.f32.gmra.mxu1 %v60_v47 }
  0x42   :  { %1134 = vmatprep.mubr.msk.f32.mxu1 %vm183_vm0, %v535_v10 }
  0x43   :  { %1101 = vmatmul.mubr.msk.f32.vlgmr.msra.gmra.mxu0 %vm183_vm0, %v32_v48  ;;  %600 = vperm.xlu1 %1170, %v554_v53  }
  0x44   :  { %1103 = vmatprep.mubr.msk.f32.mxu0 %vm183_vm0, %v37_v50  ;;  %595 = vperm.xlu0 %1169, %v553_v55  }
  0x47   :  { %1104 = vmatmul.mubr.msk.f32.gmra.mxu0 %vm183_vm0, %v42_v52  ;;  %610 = vperm.xlu1 %1170, %v556_v57  }
  0x48   :  { %1106 = vmatprep.mubr.msk.f32.mxu0 %vm183_vm0, %v47_v54  ;;  %605 = vperm.xlu0 %1169, %v555_v59  }
  0x4b   :  { %1107 = vmatmul.mubr.msk.f32.gmra.mxu0 %vm183_vm0, %v52_v56  ;;  %580 = vperm.xlu1 %1170, %v550_v61  }
  0x4c   :  { %1109 = vmatprep.mubr.msk.f32.mxu0 %vm183_vm0, %v57_v58  ;;  %575 = vperm.xlu0 %1169, %v549_v62  }
  0x4f   :  { %1110 = vmatmul.mubr.msk.f32.gmra.mxu0 %vm183_vm0, %v62_v60  ;;  %590 = vperm.xlu1 %1170, %v552_v63  }
  0x50   :  { %585 = vperm.xlu0 %1169, %v551_v0   ;;  %1128 = vmatprep.mubr.msk.f32.mxu0 %vm183_vm0, %v531_v9 }
  0x53   :  { %570 = vperm.xlu1 %1170, %v548_v1  }
  0x54   :  { %565 = vperm.xlu0 %1169, %v547_v2  }
  0x57   :  { %620 = vperm.xlu1 %1170, %v558_v3  }
  0x58   :  { %615 = vperm.xlu0 %1169, %v557_v4  }
  0x5b   :  { %630 = vperm.xlu1 %1170, %v560_v5  }
  0x5c   :  { %625 = vperm.xlu0 %1169, %v559_v6  }
  0x5f   :  { %640 = vperm.xlu1 %1170, %v562_v7  }
  0x60   :  { %635 = vperm.xlu0 %1169, %v561_v8  }
  0xa3   :  { %v171_v40 = vpop.permute.xlu1 %170 }
  0xa7   :  { %v181_v41 = vpop.permute.xlu0 %180 }
  0xb2   :  { %v166_v46 = vpop.permute.xlu1 %165 }
  0xb3   :  { %v176_v47 = vpop.permute.xlu0 %175 }
  0xb6   :  { %v156_v59 = vpop.permute.xlu1 %155 }
  0xb7   :  { %v161_v60 = vpop.permute.xlu0 %160 }
  0xe2   :  { %v1639_v11 = vpop.f32.mrf.mxu0 }
  0xe4   :  { %v1641_v12 = vpop.f32.mrf.mxu0 }
  0xe5   :  { %v1643_v13 = vpop.f32.mrf.mxu1 }
  0xe6   :  { %v967_v14 = vpop.f32.mrf.mxu0 }
  0xe7   :  { %v1645_v15 = vpop.f32.mrf.mxu1 }
  0xe8   :  { %v968_v16 = vpop.f32.mrf.mxu0 }
  0xe9   :  { %v1647_v17 = vpop.f32.mrf.mxu1  ;;  %v969_v6 = vadd.f32 %v968_v16, %v967_v14 }
  0xea   :  { %v970_v18 = vpop.f32.mrf.mxu0 }
  0xeb   :  { %v1649_v19 = vpop.f32.mrf.mxu1 }
  0xec   :  { %v971_v20 = vpop.f32.mrf.mxu0  ;;  %v1025_v14 = vadd.f32 %v1649_v19, %v1647_v17 }
  0xed   :  { %v1026_v21 = vpop.f32.mrf.mxu1  ;;  %v972_v1 = vadd.f32 %v971_v20, %v970_v18 }
  0xef   :  { %v973_v22 = vpop.f32.mrf.mxu0  ;;  %v1027_v23 = vpop.f32.mrf.mxu1 }
  0xf1   :  { %v974_v24 = vpop.f32.mrf.mxu0  ;;  %v1029_v25 = vpop.f32.mrf.mxu1 }
  0xf2   :  { %v975_v57 = vadd.f32 %v974_v24, %v973_v22  ;;  %v966_v22 = vadd.f32 %v1641_v12, %v1639_v11  ;;  %v285_v24 = vadd.f32 %v972_v1, %v156_v59  ;;  %v1022_v11 = vadd.f32 %v1645_v15, %v1643_v13 }
  0xf3   :  { %v976_v26 = vpop.f32.mrf.mxu0  ;;  %v1030_v27 = vpop.f32.mrf.mxu1 }
  0xf4   :  { %v290_v7 = vadd.f32 %v975_v57, %v161_v60  ;;  %v1031_v9 = vadd.f32 %v1030_v27, %v1029_v25 }
  0xf5   :  { %v977_v28 = vpop.f32.mrf.mxu0  ;;  %v1032_v29 = vpop.f32.mrf.mxu1 }
  0xf6   :  { %v978_v54 = vadd.f32 %v977_v28, %v976_v26  ;;  %v395_v16 = vadd.f32 %v1031_v9, %v290_v7 }
  0xf7   :  { %v979_v30 = vpop.f32.mrf.mxu0  ;;  %v1033_v31 = vpop.f32.mrf.mxu1 }
  0xf8   :  { %v295_v3 = vadd.f32 %v978_v54, %v166_v46  ;;  %v1034_v4 = vadd.f32 %v1033_v31, %v1032_v29  ;;  %v537_v46 = vld [vmem:[%s1810_s3 + $0x30] sm:$0xff]  ;;  %v544_v54 = vld [vmem:[%s1810_s3 + $0x68] sm:$0xff] }
  0xf9   :  { %v980_v32 = vpop.f32.mrf.mxu0  ;;  %v1035_v33 = vpop.f32.mrf.mxu1 }
  0xfa   :  { %v981_v51 = vadd.f32 %v980_v32, %v979_v30  ;;  %v1028_v30 = vadd.f32 %v1027_v23, %v1026_v21  ;;  %v400_v20 = vadd.f32 %v1034_v4, %v295_v3 }
  0xfb   :  { %v982_v34 = vpop.f32.mrf.mxu0  ;;  %v1036_v35 = vpop.f32.mrf.mxu1 }
  0xfc   :  { %v300_v61 = vadd.f32 %v981_v51, %v171_v40  ;;  %v1037_v62 = vadd.f32 %v1036_v35, %v1035_v33  ;;  %v146_v33 = vpop.permute.xlu1 %145  ;;  %v390_v21 = vadd.f32 %v1028_v30, %v285_v24  ;;  %v541_v51 = vld [vmem:[%s1810_s3 + $0x50] sm:$0xff] }
  0xfd   :  { %v983_v36 = vpop.f32.mrf.mxu0  ;;  %v1038_v37 = vpop.f32.mrf.mxu1 }
  0xfe   :  { %v984_v52 = vadd.f32 %v983_v36, %v982_v34  ;;  %v405_v10 = vadd.f32 %v1037_v62, %v300_v61  ;;  %v151_v34 = vpop.permute.xlu0 %150  ;;  %v275_v36 = vadd.f32 %v966_v22, %v146_v33  ;;  %v844_v22 = vld [vmem:[%s1812_s5 + $0x20] sm:$0xff] }
  0xff   :  { %v985_v38 = vpop.f32.mrf.mxu0  ;;  %v1039_v39 = vpop.f32.mrf.mxu1  ;;  %v280_v31 = vadd.f32 %v969_v6, %v151_v34  ;;  %v853_v34 = vld [vmem:[%s1812_s5 + $0x38] sm:$0xff] }
 0x100   :  { %v305_v63 = vadd.f32 %v984_v52, %v176_v47  ;;  %v1040_v0 = vadd.f32 %v1039_v39, %v1038_v37  ;;  %v380_v39 = vadd.f32 %v1022_v11, %v275_v36  ;;  %v534_v47 = vld [vmem:[%s1810_s3 + $0x18] sm:$0xff]  ;;  %v601_v57 = vpop.permute.xlu1 %600 }
 0x101   :  { %v986_v42 = vpop.f32.mrf.mxu0  ;;  %v1041_v43 = vpop.f32.mrf.mxu1  ;;  %v385_v37 = vadd.f32 %v1025_v14, %v280_v31  ;;  %v542_v52 = vld [vmem:[%s1810_s3 + $0x58] sm:$0xff]  ;;  %v852_v14 = vld [vmem:[%s1812_s5 + $0x30] sm:$0xff] }
 0x102   :  { %v987_v48 = vadd.f32 %v986_v42, %v985_v38  ;;  %v410_v28 = vadd.f32 %v1040_v0, %v305_v63 }
 0x103   :  { %v1651_v44 = vpop.f32.mrf.mxu0  ;;  %v1042_v49 = vpop.f32.mrf.mxu1 }
 0x104   :  { %v310_v55 = vadd.f32 %v987_v48, %v181_v41  ;;  %v1043_v56 = vadd.f32 %v1042_v49, %v1041_v43  ;;  %v490_v38 = vadd.f32 %v1651_v44, %v385_v37  ;;  %v532_v43 = vld [vmem:[%s1810_s3 + $0x8] sm:$0xff]  ;;  %v538_v48 = vld [vmem:[%s1810_s3 + $0x38] sm:$0xff]  ;;  %v539_v49 = vld [vmem:[%s1810_s3 + $0x40] sm:$0xff]  ;;  %v611_v59 = vpop.permute.xlu1 %610 }
 0x105   :  { %v1653_v45 = vpop.f32.mrf.mxu0  ;;  %v536_v44 = vld [vmem:[%s1810_s3 + $0x28] sm:$0xff] }
 0x106   :  { %v415_v5 = vadd.f32 %v1043_v56, %v310_v55  ;;  %v485_v13 = vadd.f32 %v1653_v45, %v380_v39  ;;  %v524_v41 = vmax.f32 %v490_v38, 0.0  ;;  %v533_v45 = vld [vmem:[%s1810_s3 + $0x10] sm:$0xff]  ;;  %v546_v56 = vld [vmem:[%s1810_s3 + $0x78] sm:$0xff] }
 0x107   :  { %v1105_v50 = vpop.f32.mrf.mxu0  ;;  %v545_v55 = vld [vmem:[%s1810_s3 + $0x70] sm:$0xff] }
 0x108   :  { %v500_v12 = vadd.f32 %v1105_v50, %v395_v16  ;;  %v523_v42 = vmax.f32 %v485_v13, 0.0  ;;  %v540_v50 = vld [vmem:[%s1810_s3 + $0x48] sm:$0xff]  ;;  %v581_v61 = vpop.permute.xlu1 %580 }
 0x109   :  { %v494_v53 = vpop.f32.mrf.mxu0 }
 0x10a   :  { %v495_v17 = vadd.f32 %v494_v53, %v390_v21  ;;  %v526_v40 = vmax.f32 %v500_v12, 0.0  ;;  %v543_v53 = vld [vmem:[%s1810_s3 + $0x60] sm:$0xff] }
 0x10b   :  { %v1108_v58 = vpop.f32.mrf.mxu0 }
 0x10c   :  { %v510_v18 = vadd.f32 %v1108_v58, %v405_v10  ;;  %v525_v15 = vmax.f32 %v495_v17, 0.0  ;;  %v596_v58 = vpop.permute.xlu0 %595  ;;  %v1721_v63 = vpop.permute.xlu1 %590  ;;  %v845_v10 = vld [vmem:[%s1812_s5 + $0x28] sm:$0xff] }
 0x10d   :  { %v504_v2 = vpop.f32.mrf.mxu0 }
 0x10e   :  { %v505_v25 = vadd.f32 %v504_v2, %v400_v20  ;;  %v528_v23 = vmax.f32 %v510_v18, 0.0 }
 0x10f   :  { %v1111_v8 = vpop.f32.mrf.mxu0 }
 0x110   :  { %v520_v26 = vadd.f32 %v1111_v8, %v415_v5  ;;  %v527_v19 = vmax.f32 %v505_v25, 0.0  ;;  %v606_v60 = vpop.permute.xlu0 %605  ;;  %v571_v1 = vpop.permute.xlu1 %570 }
 0x111   :  { %v514_v32 = vpop.f32.mrf.mxu0 }
 0x112   :  { %v530_v35 = vmax.f32 %v520_v26, 0.0  ;;  %v515_v29 = vadd.f32 %v514_v32, %v410_v28 }
 0x114   :  { %v529_v27 = vmax.f32 %v515_v29, 0.0  ;;  %1112 = vmatprep.subr.mxu0 %v530_v35  ;;  %1152 = vmatprep.subr.mxu1 %v530_v35  ;;  %v1719_v62 = vpop.permute.xlu0 %575  ;;  %v621_v24 = vpop.permute.xlu1 %620 }
 0x115   :  { %1113 = vmatpush3.msra.mxu0 %v530_v35  ;;  %1160 = vmatpush3.msra.mxu1 %v530_v35 }
 0x116   :  { %1114 = vmatprep.subr.mxu0 %v529_v27  ;;  %1153 = vmatprep.subr.mxu1 %v529_v27 }
 0x117   :  { %1115 = vmatpush3.msra.mxu0 %v529_v27  ;;  %1161 = vmatpush3.msra.mxu1 %v529_v27 }
 0x118   :  { %1116 = vmatprep.subr.mxu0 %v528_v23  ;;  %1154 = vmatprep.subr.mxu1 %v528_v23  ;;  %v1723_v0 = vpop.permute.xlu0 %585  ;;  %v631_v11 = vpop.permute.xlu1 %630 }
 0x119   :  { %1117 = vmatpush3.msra.mxu0 %v528_v23  ;;  %1162 = vmatpush3.msra.mxu1 %v528_v23 }
 0x11a   :  { %1118 = vmatprep.subr.mxu0 %v527_v19  ;;  %1155 = vmatprep.subr.mxu1 %v527_v19 }
 0x11b   :  { %1119 = vmatpush3.msra.mxu0 %v527_v19  ;;  %1163 = vmatpush3.msra.mxu1 %v527_v19 }
 0x11c   :  { %1120 = vmatprep.subr.mxu0 %v526_v40  ;;  %1156 = vmatprep.subr.mxu1 %v526_v40  ;;  %v566_v4 = vpop.permute.xlu0 %565 }
 0x11d   :  { %1121 = vmatpush3.msra.mxu0 %v526_v40  ;;  %1164 = vmatpush3.msra.mxu1 %v526_v40 }
 0x11e   :  { %1122 = vmatprep.subr.mxu0 %v525_v15  ;;  %1157 = vmatprep.subr.mxu1 %v525_v15 }
 0x11f   :  { %1123 = vmatpush3.msra.mxu0 %v525_v15  ;;  %1165 = vmatpush3.msra.mxu1 %v525_v15 }
 0x120   :  { %1124 = vmatprep.subr.mxu0 %v524_v41  ;;  %1158 = vmatprep.subr.mxu1 %v524_v41  ;;  %v616_v18 = vpop.permute.xlu0 %615 }
 0x121   :  { %1125 = vmatpush3.msra.mxu0 %v524_v41  ;;  %1166 = vmatpush3.msra.mxu1 %v524_v41  ;;  %v641_v41 = vpop.permute.xlu1 %640 }
 0x122   :  { %1126 = vmatprep.subr.mxu0 %v523_v42  ;;  %1159 = vmatprep.subr.mxu1 %v523_v42 }
 0x123   :  { %1127 = vmatpush3.msra.mxu0 %v523_v42  ;;  %1167 = vmatpush3.msra.mxu1 %v523_v42 }
 0x124   :  { %1129 = vmatmul.mubr.msk.f32.vlgmr.msra.gmra.mxu0 %vm183_vm0, %v532_v43  ;;  %1135 = vmatmul.mubr.msk.f32.vlgmr.msra.gmra.mxu1 %vm183_vm0, %v536_v44  ;;  %v626_v17 = vpop.permute.xlu0 %625 }
 0x125   :  { %1131 = vmatprep.mubr.msk.f32.mxu0 %vm183_vm0, %v533_v45  ;;  %1137 = vmatprep.mubr.msk.f32.mxu1 %vm183_vm0, %v537_v46 }
 0x128   :  { %1132 = vmatmul.mubr.msk.f32.gmra.mxu0 %vm183_vm0, %v534_v47  ;;  %1138 = vmatmul.mubr.msk.f32.gmra.mxu1 %vm183_vm0, %v538_v48  ;;  %v636_v47 = vpop.permute.xlu0 %635  ;;  %v837_v48 = vld [vmem:[%s1812_s5 + $0x8] sm:$0xff] }
 0x129   :  { %1140 = vmatprep.mubr.msk.f32.mxu1 %vm183_vm0, %v539_v49 }
 0x12c   :  { %1141 = vmatmul.mubr.msk.f32.gmra.mxu1 %vm183_vm0, %v540_v50 }
 0x12d   :  { %1143 = vmatprep.mubr.msk.f32.mxu1 %vm183_vm0, %v541_v51 }
 0x130   :  { %1144 = vmatmul.mubr.msk.f32.gmra.mxu1 %vm183_vm0, %v542_v52 }
 0x131   :  { %1146 = vmatprep.mubr.msk.f32.mxu1 %vm183_vm0, %v543_v53  ;;  %v836_v53 = vld [vmem:[%s1812_s5] sm:$0xff] }
 0x134   :  { %1147 = vmatmul.mubr.msk.f32.gmra.mxu1 %vm183_vm0, %v544_v54 }
 0x135   :  { %1149 = vmatprep.mubr.msk.f32.mxu1 %vm183_vm0, %v545_v55 }
 0x138   :  { %1150 = vmatmul.mubr.msk.f32.gmra.mxu1 %vm183_vm0, %v546_v56 }
 0x1e4   :  { %v1130_v2 = vpop.f32.mrf.mxu0  ;;  %v1725_v3 = vpop.f32.mrf.mxu1 }
 0x1e5   :  { %v763_v5 = vadd.f32 %v1130_v2, %v571_v1 }
 0x1e6   :  { %v757_v6 = vpop.f32.mrf.mxu0  ;;  %v1727_v7 = vpop.f32.mrf.mxu1 }
 0x1e7   :  { %889 = vst [vmem:[%s1811_s6 + $0x8] sm:$0xff] %v763_v5  ;;  %v758_v8 = vadd.f32 %v757_v6, %v566_v4  ;;  %v778_v2 = vadd.f32 %v1727_v7, %v1723_v0  ;;  %v840_v4 = vld [vmem:[%s1812_s5 + $0x10] sm:$0xff] }
 0x1e8   :  { %v1139_v9 = vpop.f32.mrf.mxu1  ;;  %v1133_v39 = vpop.f32.mrf.mxu0 }
 0x1e9   :  { %888 = vst [vmem:[%s1811_s6] sm:$0xff] %v758_v8  ;;  %v793_v26 = vadd.f32 %v1139_v9, %v601_v57  ;;  %v773_v45 = vadd.f32 %v1133_v39, %v581_v61  ;;  %v783_v57 = vadd.f32 %v1725_v3, %v1721_v63 }
 0x1ea   :  { %v787_v28 = vpop.f32.mrf.mxu1  ;;  %v767_v43 = vpop.f32.mrf.mxu0 }
 0x1eb   :  { %v847_v30 = vmin.f32 %v793_v26, %v845_v10  ;;  %v788_v32 = vadd.f32 %v787_v28, %v596_v58  ;;  %v768_v50 = vadd.f32 %v767_v43, %v1719_v62  ;;  %v839_v54 = vadd.f32 %v837_v48, %v773_v45  ;;  %v841_v58 = vld [vmem:[%s1812_s5 + $0x18] sm:$0xff] }
 0x1ec   :  { %v1142_v33 = vpop.f32.mrf.mxu1  ;;  %v843_v9 = vadd.f32 %v841_v58, %v783_v57 }
 0x1ed   :  { %v850_v20 = vmul.f32 1.442695, %v847_v30  ;;  %v846_v35 = vmin.f32 %v788_v32, %v844_v22  ;;  %v803_v29 = vadd.f32 %v1142_v33, %v611_v59  ;;  %v838_v61 = vadd.f32 %v836_v53, %v768_v50 }
 0x1ee   :  { %v797_v31 = vpop.f32.mrf.mxu1  ;;  %v842_v30 = vadd.f32 %v840_v4, %v778_v2 }
 0x1ef   :  { %1171 = vpow2.f32 %v850_v20  ;;  %v848_v16 = vmul.f32 1.442695, %v846_v35  ;;  %v855_v25 = vmin.f32 %v803_v29, %v853_v34  ;;  %v798_v27 = vadd.f32 %v797_v31, %v606_v60 }
 0x1f0   :  { %v1145_v36 = vpop.f32.mrf.mxu1 }
 0x1f1   :  { %1173 = vpow2.f32 %v848_v16  ;;  %v858_v12 = vmul.f32 1.442695, %v855_v25  ;;  %v854_v21 = vmin.f32 %v798_v27, %v852_v14  ;;  %v813_v23 = vadd.f32 %v1145_v36, %v621_v24 }
 0x1f2   :  { %v807_v37 = vpop.f32.mrf.mxu1 }
 0x1f3   :  { %1175 = vpow2.f32 %v858_v12  ;;  %v856_v19 = vmul.f32 1.442695, %v854_v21  ;;  %899 = vst [vmem:[%s1811_s6 + $0x58] sm:$0xff] %v813_v23  ;;  %v808_v38 = vadd.f32 %v807_v37, %v616_v18 }
 0x1f4   :  { %v1148_v40 = vpop.f32.mrf.mxu1 }
 0x1f5   :  { %1177 = vpow2.f32 %v856_v19  ;;  %898 = vst [vmem:[%s1811_s6 + $0x50] sm:$0xff] %v808_v38  ;;  %v823_v13 = vadd.f32 %v1148_v40, %v631_v11 }
 0x1f6   :  { %v817_v15 = vpop.f32.mrf.mxu1 }
 0x1f7   :  { %901 = vst [vmem:[%s1811_s6 + $0x68] sm:$0xff] %v823_v13  ;;  %v818_v42 = vadd.f32 %v817_v15, %v626_v17 }
 0x1f8   :  { %v1151_v44 = vpop.f32.mrf.mxu1 }
 0x1f9   :  { %900 = vst [vmem:[%s1811_s6 + $0x60] sm:$0xff] %v818_v42  ;;  %v833_v46 = vadd.f32 %v1151_v44, %v641_v41 }
 0x1fa   :  { %v827_v49 = vpop.f32.mrf.mxu1 }
 0x1fb   :  { %903 = vst [vmem:[%s1811_s6 + $0x78] sm:$0xff] %v833_v46  ;;  %v828_v51 = vadd.f32 %v827_v49, %v636_v47 }
 0x1fc   :  { %v1172_v52 = vpop.eup %1171 }
 0x1fd   :  { %v861_v55 = vmul.f32 0.5, %v1172_v52  ;;  %902 = vst [vmem:[%s1811_s6 + $0x70] sm:$0xff] %v828_v51 }
 0x1fe   :  { %v1174_v56 = vpop.eup %1173 }
 0x1ff   :  { %v863_v59 = vsub.f32 %v839_v54, %v861_v55  ;;  %v877_v60 = vadd.f32 %v861_v55, %v839_v54  ;;  %v860_v62 = vmul.f32 0.5, %v1174_v56 }
 0x200   :  { %v1176_v1 = vpop.eup %1175 }
 0x201   :  { %v865_v5 = vmax.f32 %v863_v59, 0.0  ;;  %v879_v6 = vmax.f32 %v877_v60, 0.0  ;;  %v862_v8 = vsub.f32 %v838_v61, %v860_v62  ;;  %v876_v63 = vadd.f32 %v860_v62, %v838_v61 }
 0x202   :  { %v1178_v3 = vpop.eup %1177  ;;  %v869_v10 = vmul.f32 0.5, %v1176_v1 }
 0x203   :  { %v867_v26 = vmin.f32 %v865_v5, 256.0  ;;  %v881_v28 = vmin.f32 %v879_v6, 256.0  ;;  %v864_v22 = vmax.f32 %v862_v8, 0.0  ;;  %v878_v24 = vmax.f32 %v876_v63, 0.0 }
 0x204   :  { %v871_v32 = vsub.f32 %v843_v9, %v869_v10  ;;  %v883_v33 = vadd.f32 %v869_v10, %v843_v9  ;;  %v868_v34 = vmul.f32 0.5, %v1178_v3 }
 0x205   :  { %891 = vst [vmem:[%s1811_s6 + $0x18] sm:$0xff] %v867_v26  ;;  %895 = vst [vmem:[%s1811_s6 + $0x38] sm:$0xff] %v881_v28  ;;  %v866_v0 = vmin.f32 %v864_v22, 256.0  ;;  %v880_v7 = vmin.f32 %v878_v24, 256.0 }
 0x206   :  { %v873_v18 = vmax.f32 %v871_v32, 0.0  ;;  %v885_v20 = vmax.f32 %v883_v33, 0.0  ;;  %v870_v35 = vsub.f32 %v842_v30, %v868_v34  ;;  %v882_v29 = vadd.f32 %v868_v34, %v842_v30 }
 0x207   :  { %890 = vst [vmem:[%s1811_s6 + $0x10] sm:$0xff] %v866_v0  ;;  %894 = vst [vmem:[%s1811_s6 + $0x30] sm:$0xff] %v880_v7 }
 0x208   :  { %v875_v31 = vmin.f32 %v873_v18, 128.0  ;;  %v887_v14 = vmin.f32 %v885_v20, 128.0  ;;  %v872_v16 = vmax.f32 %v870_v35, 0.0  ;;  %v884_v25 = vmax.f32 %v882_v29, 0.0 }
 0x20a   :  { %893 = vst [vmem:[%s1811_s6 + $0x28] sm:$0xff] %v875_v31  ;;  %897 = vst [vmem:[%s1811_s6 + $0x48] sm:$0xff] %v887_v14  ;;  %v874_v27 = vmin.f32 %v872_v16, 128.0  ;;  %v886_v36 = vmin.f32 %v884_v25, 128.0 }
 0x20c   :  { %892 = vst [vmem:[%s1811_s6 + $0x20] sm:$0xff] %v874_v27  ;;  %896 = vst [vmem:[%s1811_s6 + $0x40] sm:$0xff] %v886_v36 }

</bundles_post_ra>
